<compile_context>
chip_gen: v7x
topology: tpu7x:2x2x1
jax: 0.10.0
libtpu: 0.0.40
codegen_flags: <defaults>
</compile_context>

<pallas_src>
import functools

import jax
import jax.numpy as jnp
from jax import lax
from jax.experimental import pallas as pl
from jax.experimental.pallas import tpu as pltpu

N_IN, N_H, N_H2, N_OUT = 14, 11, 9, 7
_P = 16                                   # padded side of the packed parameter slab
BLOCK_B_MAX = 32768                       # lane-axis tile cap (review: >= 32K)
RESIDENT_LOGITS_MAX_BYTES = 12 * 1024 * 1024   # logits-in-VMEM cap (v7x-safe)
VMEM_LIMIT_BYTES = 32 * 1024 * 1024       # explicit scoped-VMEM budget (all gens)


def _round_up(n, m):
    return ((n + m - 1) // m) * m


# --------------------------------------------------------------------- compute
def _mlp_logits(p, x_bi, matmul_dtype):
    """p: packed params (3,16,16) f32.  x_bi: (block_b, N_IN) f32.

    Returns logits in lane-dense (N_OUT, block_b) f32 orientation.  The first
    dot contracts the feature axis of BOTH operands (rhs-transposed MXU
    matmul), so the batch-major input never needs an explicit transpose.
    """
    c = lambda a: a.astype(matmul_dtype)
    w1 = p[0, :N_H,  :N_IN];   b1 = p[0, :N_H,  N_IN:N_IN + 1]
    w2 = p[1, :N_H2, :N_H];    b2 = p[1, :N_H2, N_H:N_H + 1]
    w3 = p[2, :N_OUT, :N_H2];  b3 = p[2, :N_OUT, N_H2:N_H2 + 1]
    # (N_H, N_IN) x (block_b, N_IN) -> (N_H, block_b)
    h1 = lax.dot_general(c(w1), c(x_bi), (((1,), (1,)), ((), ())),
                         preferred_element_type=jnp.float32)
    h1 = jnp.maximum(h1 + b1, 0.0)                       # bias/ReLU in f32
    h2 = jnp.maximum(
        jnp.dot(c(w2), c(h1), preferred_element_type=jnp.float32) + b2, 0.0)
    return jnp.dot(c(w3), c(h2), preferred_element_type=jnp.float32) + b3


# ----------------------------------------------------------------- fused path
def _fused_kernel(x_ref, p_ref, o_ref, *, matmul_dtype):
    """Whole batch in one full-array block: logits + exact softmax over dim=0."""
    logits = _mlp_logits(p_ref[...], x_ref[...], matmul_dtype)    # (N_OUT, B)
    m = jnp.max(logits, axis=1, keepdims=True)
    e = jnp.exp(logits - m)
    o_ref[...] = e * (1.0 / jnp.sum(e, axis=1, keepdims=True))    # exact norm


# ------------------------------------------------------ fused 2-phase gridded
def _init_stats(m_ref, l_ref):
    m_ref[...] = jnp.full(m_ref.shape, -jnp.inf, m_ref.dtype)
    l_ref[...] = jnp.zeros(l_ref.shape, l_ref.dtype)


def _update_stats(masked_logits, m_ref, l_ref):
    # Note: every grid block contains >= 1 valid column (n_blocks = cdiv(B, block_b)),
    # so m_new is always finite and exp(m_old - m_new) never hits (-inf) - (-inf).
    m_old = m_ref[...]
    m_new = jnp.maximum(m_old, jnp.max(masked_logits, axis=1, keepdims=True))
    l_ref[...] = l_ref[...] * jnp.exp(m_old - m_new) + jnp.sum(
        jnp.exp(masked_logits - m_new), axis=1, keepdims=True)
    m_ref[...] = m_new


def _grid_resident_kernel(x_ref, p_ref, o_ref, logits_vmem, m_ref, l_ref,
                          *, batch, block_b, matmul_dtype):
    """Phase 0: logits + online stats (logits kept resident in VMEM scratch).
    Phase 1: normalize from the resident logits."""
    phase, i = pl.program_id(0), pl.program_id(1)
    off = pl.multiple_of(i * block_b, 128)

    @pl.when((phase == 0) & (i == 0))
    def _():
        _init_stats(m_ref, l_ref)

    @pl.when(phase == 0)
    def _():
        logits = _mlp_logits(p_ref[...], x_ref[...], matmul_dtype)
        col = off + lax.broadcasted_iota(jnp.int32, logits.shape, 1)
        masked = jnp.where(col < batch, logits, -jnp.inf)     # ragged last block
        logits_vmem[:, pl.ds(off, block_b)] = masked
        _update_stats(masked, m_ref, l_ref)

    @pl.when(phase == 1)
    def _():
        inv_l = 1.0 / l_ref[...]                              # exact (7,1) divide
        o_ref[...] = jnp.exp(
            logits_vmem[:, pl.ds(off, block_b)] - m_ref[...]) * inv_l


def _grid_recompute_kernel(x_ref, p_ref, o_ref, m_ref, l_ref,
                           *, batch, block_b, matmul_dtype):
    """Same two phases, but logits are recomputed in phase 1 (no big scratch)."""
    phase, i = pl.program_id(0), pl.program_id(1)

    logits = _mlp_logits(p_ref[...], x_ref[...], matmul_dtype)
    col = i * block_b + lax.broadcasted_iota(jnp.int32, logits.shape, 1)
    masked = jnp.where(col < batch, logits, -jnp.inf)

    @pl.when((phase == 0) & (i == 0))
    def _():
        _init_stats(m_ref, l_ref)

    @pl.when(phase == 0)
    def _():
        _update_stats(masked, m_ref, l_ref)

    @pl.when(phase == 1)
    def _():
        o_ref[...] = jnp.exp(masked - m_ref[...]) * (1.0 / l_ref[...])


# --------------------------------------------------------------------- wrapper
def neural_network_forward(x, packed_params, *, block_b=None, resident=None,
                           matmul_dtype=jnp.float32):
    """x: (B, 14) -> (B, 7), softmax over dim=0 (the batch axis)."""
    B, n_in = x.shape
    assert n_in == N_IN
    x = x.astype(jnp.float32)

    if block_b is None:
        block_b = BLOCK_B_MAX
    block_b = max(128, _round_up(min(block_b, BLOCK_B_MAX), 128))

    if B <= block_b:
        # Single fused block: full-array BlockSpecs, softmax in one shot.
        out_fb = pl.pallas_call(
            functools.partial(_fused_kernel, matmul_dtype=matmul_dtype),
            grid=(1,),
            in_specs=[pl.BlockSpec((B, N_IN), lambda i: (0, 0)),
                      pl.BlockSpec((3, _P, _P), lambda i: (0, 0, 0))],
            out_specs=pl.BlockSpec((N_OUT, B), lambda i: (0, 0)),
            out_shape=jax.ShapeDtypeStruct((N_OUT, B), jnp.float32),
            compiler_params=pltpu.CompilerParams(
                dimension_semantics=("arbitrary",),
                vmem_limit_bytes=VMEM_LIMIT_BYTES),
        )(x, packed_params)
    else:
        n_blocks = (B + block_b - 1) // block_b
        b_pad = n_blocks * block_b
        if resident is None:
            resident = (N_OUT * 4 * b_pad) <= RESIDENT_LOGITS_MAX_BYTES

        p_spec = pl.BlockSpec((3, _P, _P), lambda p, i: (0, 0, 0))
        # Output window parked on block 0 during phase 0 (no HBM writes until
        # phase 1), then walks the blocks once during phase 1.
        o_spec = pl.BlockSpec((N_OUT, block_b), lambda p, i: (0, i * p))
        stats = [pltpu.VMEM((N_OUT, 1), jnp.float32),
                 pltpu.VMEM((N_OUT, 1), jnp.float32)]

        if resident:
            kernel = functools.partial(_grid_resident_kernel, batch=B,
                                       block_b=block_b, matmul_dtype=matmul_dtype)
            # Phase 1 never touches x: park its input window on block 0 so x
            # is streamed from HBM exactly once.
            x_spec = pl.BlockSpec((block_b, N_IN), lambda p, i: (i * (1 - p), 0))
            scratch = [pltpu.VMEM((N_OUT, b_pad), jnp.float32)] + stats
        else:
            kernel = functools.partial(_grid_recompute_kernel, batch=B,
                                       block_b=block_b, matmul_dtype=matmul_dtype)
            x_spec = pl.BlockSpec((block_b, N_IN), lambda p, i: (i, 0))
            scratch = stats

        out_fb = pl.pallas_call(
            kernel,
            grid=(2, n_blocks),                 # (phase, batch-block); phase outermost
            in_specs=[x_spec, p_spec],
            out_specs=o_spec,
            out_shape=jax.ShapeDtypeStruct((N_OUT, B), jnp.float32),
            scratch_shapes=scratch,
            compiler_params=pltpu.CompilerParams(
                dimension_semantics=("arbitrary", "arbitrary"),
                vmem_limit_bytes=VMEM_LIMIT_BYTES),
        )(x, packed_params)

    # Module semantics require (B, 7): pay the layout change once, outside the
    # lane-dense kernel.
    return out_fb.T


# --------------------------------------------------------------------- params
def init_params(key):
    """Torch-Linear-like init.  Weights stored torch-style: (out, in)."""
    ks = jax.random.split(key, 6)

    def lin(kw, kb, fan_in, fan_out):
        bound = 1.0 / jnp.sqrt(fan_in)
        w = jax.random.uniform(kw, (fan_out, fan_in), jnp.float32, -bound, bound)
        b = jax.random.uniform(kb, (fan_out,), jnp.float32, -bound, bound)
        return w, b

    w1, b1 = lin(ks[0], ks[1], N_IN, N_H)
    w2, b2 = lin(ks[2], ks[3], N_H, N_H2)
    w3, b3 = lin(ks[4], ks[5], N_H2, N_OUT)
    return (w1, b1, w2, b2, w3, b3)


def pack_params(params):
    """Pack all 6 params into one padded (3,16,16) slab (bias in column `in`)."""
    w1, b1, w2, b2, w3, b3 = params
    p = jnp.zeros((3, _P, _P), jnp.float32)
    p = p.at[0, :N_H, :N_IN].set(w1)
    p = p.at[0, :N_H, N_IN].set(b1)
    p = p.at[1, :N_H2, :N_H].set(w2)
    p = p.at[1, :N_H2, N_H].set(b2)
    p = p.at[2, :N_OUT, :N_H2].set(w3)
    p = p.at[2, :N_OUT, N_H2].set(b3)
    return p


def reference_forward(x, params):
    w1, b1, w2, b2, w3, b3 = params
    hp = jax.lax.Precision.HIGHEST
    h1 = jnp.maximum(jnp.dot(x, w1.T, precision=hp) + b1, 0.0)
    h2 = jnp.maximum(jnp.dot(h1, w2.T, precision=hp) + b2, 0.0)
    logits = jnp.dot(h2, w3.T, precision=hp) + b3
    return jax.nn.softmax(logits, axis=0)          # dim=0, like the PyTorch module


# ----------------------------------------------------------------------- main
def _check(name, out, ref, *, rtol, atol):
    assert out.shape == ref.shape, (name, out.shape, ref.shape)
    err = float(jnp.max(jnp.abs(out - ref)))
    assert jnp.allclose(out, ref, rtol=rtol, atol=atol), (name, err)
    # softmax over dim=0 -> every one of the 7 output columns sums to 1
    col_sums = jnp.sum(out, axis=0)
    assert jnp.allclose(col_sums, jnp.ones_like(col_sums), atol=1e-4), (name,)


if __name__ == "__main__":
    key = jax.random.PRNGKey(0)
    k_p, k1, k2, k3 = jax.random.split(key, 4)

    params = init_params(k_p)
    packed = pack_params(params)

    # Tolerance note: the in-kernel MXU matmul and the XLA reference may use
    # different f32 matmul precision strategies on TPU; 3% rtol covers that
    # while still catching any masking / softmax-axis / stats bug.
    RTOL, ATOL = 3e-2, 1e-5

    # 1) Small batch -> single fused full-array block.
    x1 = jax.random.normal(k1, (8, N_IN), jnp.float32)
    out1 = jax.block_until_ready(neural_network_forward(x1, packed))
    _check("fused_small", out1, reference_forward(x1, params), rtol=RTOL, atol=ATOL)

    # 2) Medium batch, default tiling (still one full-array block, no padding).
    x2 = jax.random.normal(k2, (600, N_IN), jnp.float32)
    out2 = jax.block_until_ready(neural_network_forward(x2, packed))
    _check("fused_medium", out2, reference_forward(x2, params), rtol=RTOL, atol=ATOL)

    # 3) Forced small block -> fused 2-phase grid, logits resident in VMEM.
    out3 = jax.block_until_ready(neural_network_forward(x2, packed, block_b=256))
    _check("grid_resident", out3, reference_forward(x2, params), rtol=RTOL, atol=ATOL)
    # Self-consistency vs the fused path (same matmul precision, only the
    # online-softmax summation order differs).
    assert jnp.allclose(out3, out2, rtol=5e-3, atol=1e-6)

    # 4) Recompute-logits variant with a ragged last block.
    x4 = jax.random.normal(k3, (777, N_IN), jnp.float32)
    out4 = jax.block_until_ready(
        neural_network_forward(x4, packed, block_b=128, resident=False))
    _check("grid_recompute", out4, reference_forward(x4, params), rtol=RTOL, atol=ATOL)

    # 5) bf16 MXU operands (f32 accumulation): sanity — finite and exactly
    #    normalized softmax over dim=0.
    out5 = jax.block_until_ready(
        neural_network_forward(x2, packed, block_b=256, matmul_dtype=jnp.bfloat16))
    assert out5.shape == (600, N_OUT)
    assert bool(jnp.all(jnp.isfinite(out5)))
    assert jnp.allclose(jnp.sum(out5, axis=0), jnp.ones((N_OUT,)), atol=1e-3)

    print("KERNEL_OK")
</pallas_src>

<mosaic_0001>
module attributes {stable_mosaic.version = 11 : i64} {
  func.func @_fused_kernel(%arg0: i32, %arg1: memref<8x14xf32, #tpu.memory_space<vmem>>, %arg2: memref<3x16x16xf32, #tpu.memory_space<vmem>>, %arg3: memref<7x8xf32, #tpu.memory_space<vmem>>) attributes {dimension_semantics = [#tpu.dimension_semantics<arbitrary>], iteration_bounds = array<i64: 1>, scalar_prefetch = 0 : i64, scratch_operands = 0 : i64, tpu.core_type = #tpu.core_type<tc>, window_params = [{pipeline_mode = #tpu.pipeline_mode<synchronous>, transform_indices = @transform_0, window_bounds = array<i64: 8, 14>}, {pipeline_mode = #tpu.pipeline_mode<synchronous>, transform_indices = @transform_1, window_bounds = array<i64: 3, 16, 16>}, {pipeline_mode = #tpu.pipeline_mode<synchronous>, transform_indices = @transform_2, window_bounds = array<i64: 7, 8>}]} {
    %c0 = arith.constant 0 : index
    %c0_0 = arith.constant 0 : index
    %c0_1 = arith.constant 0 : index
    %0 = vector.load %arg2[%c0, %c0_0, %c0_1] : memref<3x16x16xf32, #tpu.memory_space<vmem>>, vector<3x16x16xf32>
    %c0_2 = arith.constant 0 : index
    %c0_3 = arith.constant 0 : index
    %1 = vector.load %arg1[%c0_2, %c0_3] : memref<8x14xf32, #tpu.memory_space<vmem>>, vector<8x14xf32>
    %2 = vector.extract_strided_slice %0 {offsets = [0, 0, 0], sizes = [1, 11, 14], strides = [1, 1, 1]} : vector<3x16x16xf32> to vector<1x11x14xf32>
    %3 = vector.shape_cast %2 : vector<1x11x14xf32> to vector<11x14xf32>
    %4 = vector.extract_strided_slice %0 {offsets = [0, 0, 14], sizes = [1, 11, 1], strides = [1, 1, 1]} : vector<3x16x16xf32> to vector<1x11x1xf32>
    %5 = vector.shape_cast %4 : vector<1x11x1xf32> to vector<11x1xf32>
    %6 = vector.extract_strided_slice %0 {offsets = [1, 0, 0], sizes = [1, 9, 11], strides = [1, 1, 1]} : vector<3x16x16xf32> to vector<1x9x11xf32>
    %7 = vector.shape_cast %6 : vector<1x9x11xf32> to vector<9x11xf32>
    %8 = vector.extract_strided_slice %0 {offsets = [1, 0, 11], sizes = [1, 9, 1], strides = [1, 1, 1]} : vector<3x16x16xf32> to vector<1x9x1xf32>
    %9 = vector.shape_cast %8 : vector<1x9x1xf32> to vector<9x1xf32>
    %10 = vector.extract_strided_slice %0 {offsets = [2, 0, 0], sizes = [1, 7, 9], strides = [1, 1, 1]} : vector<3x16x16xf32> to vector<1x7x9xf32>
    %11 = vector.shape_cast %10 : vector<1x7x9xf32> to vector<7x9xf32>
    %12 = vector.extract_strided_slice %0 {offsets = [2, 0, 9], sizes = [1, 7, 1], strides = [1, 1, 1]} : vector<3x16x16xf32> to vector<1x7x1xf32>
    %13 = vector.shape_cast %12 : vector<1x7x1xf32> to vector<7x1xf32>
    %cst = arith.constant dense<0.000000e+00> : vector<11x8xf32>
    %14 = tpu.matmul %3, %1, %cst {dimension_numbers = #tpu.dot_dimension_numbers<[1], [1], [0], [0], [0, 0, 1, 0], [], []>} : vector<11x14xf32>, vector<8x14xf32>, vector<11x8xf32> -> vector<11x8xf32>
    %15 = vector.broadcast %5 : vector<11x1xf32> to vector<11x8xf32>
    %16 = arith.addf %14, %15 : vector<11x8xf32>
    %cst_4 = arith.constant 0.000000e+00 : f32
    %17 = vector.broadcast %cst_4 : f32 to vector<11x8xf32>
    %18 = arith.maximumf %16, %17 : vector<11x8xf32>
    %cst_5 = arith.constant dense<0.000000e+00> : vector<9x8xf32>
    %19 = tpu.matmul %7, %18, %cst_5 {dimension_numbers = #tpu.dot_dimension_numbers<[1], [0], [0], [1], [0, 0, 1, 1], [], []>} : vector<9x11xf32>, vector<11x8xf32>, vector<9x8xf32> -> vector<9x8xf32>
    %20 = vector.broadcast %9 : vector<9x1xf32> to vector<9x8xf32>
    %21 = arith.addf %19, %20 : vector<9x8xf32>
    %cst_6 = arith.constant 0.000000e+00 : f32
    %22 = vector.broadcast %cst_6 : f32 to vector<9x8xf32>
    %23 = arith.maximumf %21, %22 : vector<9x8xf32>
    %cst_7 = arith.constant dense<0.000000e+00> : vector<7x8xf32>
    %24 = tpu.matmul %11, %23, %cst_7 {dimension_numbers = #tpu.dot_dimension_numbers<[1], [0], [0], [1], [0, 0, 1, 1], [], []>} : vector<7x9xf32>, vector<9x8xf32>, vector<7x8xf32> -> vector<7x8xf32>
    %25 = vector.broadcast %13 : vector<7x1xf32> to vector<7x8xf32>
    %26 = arith.addf %24, %25 : vector<7x8xf32>
    %cst_8 = arith.constant dense<0xFF800000> : vector<7xf32>
    %27 = vector.multi_reduction <maximumf>, %26, %cst_8 [1] : vector<7x8xf32> to vector<7xf32>
    %28 = vector.shape_cast %27 : vector<7xf32> to vector<7x1xf32>
    %29 = vector.broadcast %28 : vector<7x1xf32> to vector<7x8xf32>
    %30 = arith.subf %26, %29 : vector<7x8xf32>
    %31 = math.exp %30 : vector<7x8xf32>
    %cst_9 = arith.constant dense<0.000000e+00> : vector<7xf32>
    %32 = vector.multi_reduction <add>, %31, %cst_9 [1] : vector<7x8xf32> to vector<7xf32>
    %33 = vector.shape_cast %32 : vector<7xf32> to vector<7x1xf32>
    %cst_10 = arith.constant 1.000000e+00 : f32
    %34 = vector.broadcast %cst_10 : f32 to vector<7x1xf32>
    %35 = arith.divf %34, %33 : vector<7x1xf32>
    %36 = vector.broadcast %35 : vector<7x1xf32> to vector<7x8xf32>
    %37 = arith.mulf %31, %36 : vector<7x8xf32>
    %c0_11 = arith.constant 0 : index
    %c0_12 = arith.constant 0 : index
    %38 = vector.load %arg3[%c0_11, %c0_12] : memref<7x8xf32, #tpu.memory_space<vmem>>, vector<7x8xf32>
    tpu.vector_store %arg3[%c0_11, %c0_12], %37 {strides = array<i32>} : memref<7x8xf32, #tpu.memory_space<vmem>>, vector<7x8xf32>,
    return
  }
  func.func @transform_0(%arg0: i32) -> (i32, i32) {
    %c0_i32 = arith.constant 0 : i32
    %c0_i32_0 = arith.constant 0 : i32
    %c0_i32_1 = arith.constant 0 : i32
    return %c0_i32, %c0_i32_0 : i32, i32
  }
  func.func @transform_1(%arg0: i32) -> (i32, i32, i32) {
    %c0_i32 = arith.constant 0 : i32
    %c0_i32_0 = arith.constant 0 : i32
    %c0_i32_1 = arith.constant 0 : i32
    %c0_i32_2 = arith.constant 0 : i32
    return %c0_i32, %c0_i32_0, %c0_i32_1 : i32, i32, i32
  }
  func.func @transform_2(%arg0: i32) -> (i32, i32) {
    %c0_i32 = arith.constant 0 : i32
    %c0_i32_0 = arith.constant 0 : i32
    %c0_i32_1 = arith.constant 0 : i32
    return %c0_i32, %c0_i32_0 : i32, i32
  }
}

</mosaic_0001>

<bundles_post_ra>
// kernel: tpu_custom_call.1
= control target key start
LH: loop header
LB: loop body
LE: loop exit
PB: predicated region body
PF: predicated region fallthrough
CT: control target
= control target key end

     0   :  { %7 = vsyncpa [#allocation3], 0  ;;  %s562_s0 = inlined_call_operand.hbm [shape: f32[8,14], index: 0, kind: input, shape index: {}]   ;;  %s563_s1 = inlined_call_operand.hbm [shape: f32[3,16,16], index: 1, kind: input, shape index: {}]   ;;  %s564_s2 = inlined_call_operand.hbm [shape: f32[7,8], index: 2, kind: output, shape index: {}]  }
   0x1   :  { %8 = vsyncpa [#allocation6], 0 }
   0x2   :  { %9 = vsyncpa [#allocation4], 0  ;;  %s485_s9 = smov [#allocation2]   ;;  %s486_s11 = smov [#allocation5]  }
   0x3   :  { %s16_s10 = sshll.u32 %s485_s9, 4  ;;  %s25_s12 = sshll.u32 %s486_s11, 4  ;;  %s17_s10 = int_to_ptr.vmem [resolvable:$true] %s16_s10  ;;  %s512_s12 = int_to_ptr.vmem [resolvable:$true] %s25_s12 }
   0x4   :  { %s413_s15 = scalar_lea.hbm %s562_s0, 128 }
   0x5   :  { %p414_p0 = scmp.ne.s32.totalorder %s562_s0, %s413_s15  ;;  %p417_p1 = scmp.lt.u32.totalorder %s413_s15, %s562_s0 }
   0x7   :  { %p419_p2 = pnand %p417_p1, %p414_p0 }
   0x9   :  { %422 = shalt.err (!%p419_p2)
}
   0xa   :  { %s423_s20 = scalar_lea.vmem %s17_s10, 128  ;;  %p428_p4 = scmp.lt.s32.totalorder %s17_s10, %s17_s10 }
   0xb   :  { %p424_p3 = scmp.ne.s32.totalorder %s17_s10, %s423_s20  ;;  %p429_p5 = scmp.lt.s32.totalorder %s423_s20, %s423_s20 }
   0xd   :  { %p430_p6 = por %p429_p5, %p428_p4 }
   0xf   :  { %p431_p7 = pnand %p430_p6, %p424_p3 }
  0x11   :  { %434 = shalt.err (!%p431_p7)
}
  0x12   :  { %19 = dma.hbm_to_vmem [thread:$0]  %s562_s0, 128, %s17_s10, [#allocation3]  }
  0x13   :  { %s435_s25 = scalar_lea.hbm %s563_s1, 768 }
  0x14   :  { %p436_p8 = scmp.ne.s32.totalorder %s563_s1, %s435_s25  ;;  %p439_p9 = scmp.lt.u32.totalorder %s435_s25, %s563_s1 }
  0x16   :  { %p441_p10 = pnand %p439_p9, %p436_p8 }
  0x18   :  { %444 = shalt.err (!%p441_p10)
}
  0x19   :  { %s445_s30 = scalar_lea.vmem %s512_s12, 768  ;;  %p450_p12 = scmp.lt.s32.totalorder %s512_s12, %s512_s12 }
  0x1a   :  { %p446_p11 = scmp.ne.s32.totalorder %s512_s12, %s445_s30  ;;  %p451_p13 = scmp.lt.s32.totalorder %s445_s30, %s445_s30 }
  0x1c   :  { %p452_p0 = por %p451_p13, %p450_p12 }
  0x1e   :  { %p453_p1 = pnand %p452_p0, %p446_p11 }
  0x20   :  { %456 = shalt.err (!%p453_p1)
}
  0x21   :  { %s487_s0 = smov 128   ;;  %s488_s3 = smov 8  }
  0x22   :  { %31 = dma.hbm_to_vmem [thread:$0]  %s563_s1, 768, %s512_s12, [#allocation6], %s487_s0, %s487_s0, %s488_s3  }
  0x23   :  { %479 = dma.done.wait [#allocation3], 128  }
  0x24   :  { %480 = vsyncadd [#allocation3], 4294967168 }
  0x25   :  { %481 = dma.done.wait [#allocation6], 768  }
  0x26   :  { %482 = vsyncadd [#allocation6], 4294966528  ;;  %v489_v0 = vmov 14   ;;  %vm54_vm0 = vcmask 113664   ;;  %v43_v1 = vld [vmem:[#allocation2] sm:$0xff]  ;;  %v38_v2 = vld [vmem:[#allocation5] sm:$0xff] }
  0x27   :  { %406 = vset.pattern.permute.xlu0 %v489_v0  ;;  %365 = vmatprep.subr.msk.mxu0 %vm54_vm0, %v43_v1  ;;  %v39_v3 = vld [vmem:[#allocation5 + $0x8] sm:$0xff]  ;;  %v40_v4 = vld [vmem:[#allocation5 + $0x10] sm:$0xff]  ;;  %vm149_vm1 = vcmask 89088   ;;  %v490_v5 = vmov 11   ;;  %v41_v6 = vld [vmem:[#allocation5 + $0x18] sm:$0xff]  ;;  %vm154_vm2 = vcmask 1042432  }
  0x28   :  { %367 = vmatprep.mubr.msk.f32.mxu0 %vm54_vm0, %v38_v2  ;;  %366 = vmatpush3.xpose.msk.msra.mxu0 %vm54_vm0, %v43_v1  ;;  %vm491_vm3 = vmmov 1   ;;  %v492_v16 = vmov 0.0|0.0   ;;  %vm493_vm5 = vmmov 0   ;;  %v494_v17 = vmov 0.0   ;;  %v42_v18 = vld [vmem:[#allocation5 + $0x20] sm:$0xff]  ;;  %s496_s1 = smov [#allocation7]  }
  0x29   :  { %46 = vperm.xlu0 %406, %v38_v2   ;;  %374 = vmatprep.mubr.msk.f32.mxu1 %vm149_vm1, %v40_v4  ;;  %vm385_vm4 = vmpackc.low %vm154_vm2, %vm491_vm3  ;;  %v495_v19 = vmov 9   ;;  %vm243_vm6 = vcmask 1040384   ;;  %vm240_vm8 = vcmask 72704   ;;  %vm317_vm9 = vcmask 63488   ;;  %s337_s6 = sshll.u32 %s496_s1, 4  ;;  %s338_s6 = int_to_ptr.vmem [resolvable:$true] %s337_s6 }
  0x2a   :  { %407 = vset.pattern.permute.xlu1 %v490_v5  ;;  %390 = vmatprep.subr.bf16.mxu0 %v492_v16  ;;  %vm392_vm7 = vmpackc.low %vm243_vm6, %vm491_vm3  ;;  %s457_s7 = scalar_lea.vmem %s338_s6, 128  ;;  %p462_p3 = scmp.lt.s32.totalorder %s338_s6, %s338_s6 }
  0x2b   :  { %368 = vmatmul.mubr.msk.f32.vlgmr.msra.gmra.mrb[0].mxu0 %vm54_vm0, %v39_v3  ;;  %141 = vperm.xlu1 %407, %v40_v4   ;;  %p458_p2 = scmp.ne.s32.totalorder %s338_s6, %s457_s7  ;;  %p463_p4 = scmp.lt.s32.totalorder %s457_s7, %s457_s7 }
  0x2c   :  { %381 = vmatprep.mubr.msk.f32.mxu0 %vm493_vm5, %v494_v17 }
  0x2d   :  { %51 = vperm.xlu0 %406, %v39_v3   ;;  %p464_p5 = por %p463_p4, %p462_p3 }
  0x2f   :  { %146 = vperm.xlu1 %407, %v41_v6   ;;  %p465_p6 = pnand %p464_p5, %p458_p2 }
  0x31   :  { %408 = vset.pattern.permute.xlu0 %v495_v19 }
  0x32   :  { %237 = vperm.xlu0 %408, %v42_v18  }
  0xa8   :  { %v47_v7 = vpop.permute.xlu0 %46 }
  0xaa   :  { %v142_v20 = vpop.permute.xlu1 %141 }
  0xac   :  { %v52_v8 = vpop.permute.xlu0 %51 }
  0xae   :  { %v147_v21 = vpop.permute.xlu1 %146 }
  0xb1   :  { %v238_v29 = vpop.permute.xlu0 %237 }
  0xfe   :  { %v369_v9 = vpop.f32.mrb[0].mxu0 }
  0xff   :  { %v134_v10 = vadd.f32 %v369_v9, %v52_v8  ;;  %v128_v11 = vpop.f32.mrb[1].mxu0 }
 0x100   :  { %v129_v12 = vadd.f32 %v128_v11, %v47_v7 }
 0x101   :  { %v138_v13 = vmax.f32 %v134_v10, 0.0 }
 0x102   :  { %v137_v14 = vmax.f32 %v129_v12, 0.0 }
 0x104   :  { %v384_v15 = vpack.c.bf16 %v138_v13, %v137_v14 }
 0x106   :  { %386 = vmatprep.subr.msk.bf16.mxu1 %vm385_vm4, %v384_v15 }
 0x107   :  { %389 = vmatpush3.bf16.msk.msra.mxu1 %vm385_vm4, %v384_v15 }
 0x10a   :  { %375 = vmatmul.mubr.msk.f32.vlgmr.msra.gmra.mrb[0].mxu1 %vm149_vm1, %v41_v6 }
 0x1dd   :  { %v376_v22 = vpop.f32.mrb[0].mxu1 }
 0x1de   :  { %v230_v23 = vadd.f32 %v376_v22, %v147_v21  ;;  %v224_v24 = vpop.f32.mrb[1].mxu1 }
 0x1df   :  { %v225_v25 = vadd.f32 %v224_v24, %v142_v20 }
 0x1e0   :  { %v234_v26 = vmax.f32 %v230_v23, 0.0 }
 0x1e1   :  { %v233_v27 = vmax.f32 %v225_v25, 0.0 }
 0x1e3   :  { %v391_v28 = vpack.c.bf16 %v234_v26, %v233_v27 }
 0x1e5   :  { %393 = vmatpush3.bf16.msk.msra.mxu0 %vm392_vm7, %v391_v28 }
 0x1e8   :  { %382 = vmatmul.mubr.msk.f32.vlgmr.msra.gmra.mrb[2].mxu0 %vm240_vm8, %v42_v18 }
 0x2bb   :  { %v313_v30 = vpop.f32.mrb[2].mxu0 }
 0x2bc   :  { %v314_v31 = vadd.f32 %v313_v30, %v238_v29  ;;  %v383_v32 = vpop.f32.mrb[3].mxu0 }
 0x2be   :  { %v318_v33 = vsel %vm317_vm9, %v314_v31, -inf }
 0x2bf   :  { %319 = vmax.xlane.f32.xlu1 %v318_v33 }
 0x34c   :  { %v320_v34 = vpop.xlane.xlu1 %319 }
 0x34d   :  { %v321_v35 = vsub.f32 %v314_v31, %v320_v34 }
 0x34f   :  { %v322_v36 = vmul.f32 1.442695, %v321_v35 }
 0x351   :  { %409 = vpow2.f32 %v322_v36 }
 0x35b   :  { %v410_v37 = vpop.eup %409 }
 0x35c   :  { %v324_v38 = vsel %vm317_vm9, %v410_v37, 0.0 }
 0x35d   :  { %325 = vadd.xlane.f32.xlu0 %v324_v38 }
 0x3ea   :  { %v326_v39 = vpop.xlane.xlu0 %325 }
 0x3eb   :  { %411 = vrcp.f32 %v326_v39 }
 0x3f5   :  { %v412_v40 = vpop.eup %411 }
 0x3f6   :  { %v329_v41 = vmul.f32 %v412_v40, %v410_v37 }
 0x3f8   :  { %330 = vst.msk [vmem:[#allocation7] sm:$0x7f] %vm317_vm9, %v329_v41 }
 0x3f9   :  { %468 = shalt.err (!%p465_p6)
}
 0x3fa   :  { %s469_s10 = scalar_lea.hbm %s564_s2, 128 }
 0x3fb   :  { %p470_p7 = scmp.ne.s32.totalorder %s564_s2, %s469_s10  ;;  %p473_p8 = scmp.lt.u32.totalorder %s469_s10, %s564_s2 }
 0x3fd   :  { %p475_p9 = pnand %p473_p8, %p470_p7 }
 0x3ff   :  { %478 = shalt.err (!%p475_p9)
}
 0x400   :  { %340 = dma.vmem_to_hbm [thread:$0]  %s338_s6, 128, %s564_s2, [#allocation4]  }
 0x401   :  { %483 = dma.done.wait [#allocation4], 128  }
 0x402   :  { %484 = vsyncadd [#allocation4], 4294967168 }
 0x403   :  { %344 = vsyncpa [#allocation3], 1 }
 0x404   :  { %345 = vsyncpa [#allocation6], 1 }
 0x405   :  { %346 = vsyncpa [#allocation4], 1 }

</bundles_post_ra>
